<compile_context>
chip_gen: v6e
topology: v6e:2x2x1
jax: 0.10.0
libtpu: 0.0.40
codegen_flags: <defaults>
</compile_context>

<pallas_src>
import jax
import jax.numpy as jnp
from jax.experimental import pallas as pl
from jax.experimental.pallas import tpu as pltpu


def _round_up(x, m):
    return ((x + m - 1) // m) * m


def _choose_fold(d_in, hidden):
    # How many samples to fold into one 128-lane row (block-diagonal weights).
    # Capped so the folded hidden width stays modest.
    return max(1, min(128 // max(d_in, 1), 512 // max(hidden, 1)))


def _net_baseline_kernel(x_ref, w1_ref, b1_ref, w2_ref, b2_ref, out_ref):
    """One batch tile of the folded two-layer MLP.

    x_ref : (tb8, fold*d_in)     f32  (streamed over the batch grid axis)
    w1_ref: (fold*d_in, fold*H)  f32/bf16 block-diagonal copies of W1 (resident)
    b1_ref: (1, fold*H)          f32
    w2_ref: (fold*H, fold)       f32/bf16 block-diagonal copies of W2[:, 0]
    b2_ref: (1, 1)               f32
    out_ref: (tb8, fold)         f32  -- out[r, f] is sample fold*r + f
    """
    # In-kernel cast of the MXU operands (no extra HBM pass over x); identity
    # when the weights are f32. Accumulation stays f32 via preferred_element_type.
    x = x_ref[...].astype(w1_ref.dtype)
    h = jnp.dot(x, w1_ref[...], preferred_element_type=jnp.float32)   # (tb8, fold*H)
    h = jnp.maximum(h + b1_ref[...], 0.0)                             # bias + ReLU, f32
    o = jnp.dot(h.astype(w2_ref.dtype), w2_ref[...],
                preferred_element_type=jnp.float32)                   # (tb8, fold)
    out_ref[...] = jnp.tanh(o + b2_ref[...])


def prepare_params(w1, b1, w2, b2, *, use_bf16=False):
    """Build the folded (block-diagonal) weights once at init (not per call).

    w1: (d_in, H)  b1: (H,)  w2: (H, 1)  b2: (1,)  -- nn.Linear weights, stored
    transposed as (in_features, out_features).
    Returns (w1_blk, b1_blk, w2_blk, b2_11).
    """
    d_in, hidden = w1.shape
    fold = _choose_fold(d_in, hidden)
    eye = jnp.eye(fold, dtype=jnp.float32)
    w1_blk = jnp.kron(eye, w1.astype(jnp.float32))                       # (fold*d_in, fold*H)
    w2_blk = jnp.kron(eye, w2.reshape(hidden, 1).astype(jnp.float32))    # (fold*H, fold)
    if use_bf16:
        # bf16 MXU operands (v6e/v7x MXUs are bf16-native); biases stay f32 so
        # the bias-add / ReLU / tanh run on f32 accumulations.
        w1_blk = w1_blk.astype(jnp.bfloat16)
        w2_blk = w2_blk.astype(jnp.bfloat16)
    b1_blk = jnp.tile(b1.astype(jnp.float32).reshape(1, hidden), (1, fold))  # (1, fold*H)
    b2_11 = b2.astype(jnp.float32).reshape(1, 1)
    return w1_blk, b1_blk, w2_blk, b2_11


def stack_params(params_list):
    """Stack per-member prepared params into (P, ...) arrays for the population path."""
    return tuple(jnp.stack(ps) for ps in zip(*params_list))


def _choose_batch_tile(n_rows, block_rows8):
    if n_rows <= block_rows8:
        if n_rows >= 256:
            # Split a single large tile in two so both v7x TensorCores get a
            # grid step (one extra ~0.35us step on single-TC v5e/v6e: negligible).
            return _round_up(pl.cdiv(n_rows, 2), 8)
        return n_rows                 # full-array block: no divisibility constraint
    return block_rows8                # interior blocks: multiple of 8 by construction


def net_baseline_forward(x, params, *, block_rows=8192):
    """x: (B, d_in) f32.

    params: output of prepare_params (single net) -> returns (B, 1) f32, or
            output of stack_params over P members  -> returns (P, B, 1) f32.
    """
    single = params[0].ndim == 2
    if single:
        params = tuple(p[None] for p in params)
    w1s, b1s, w2s, b2s = params
    P, K, N = w1s.shape
    fold = w2s.shape[-1]
    d_in = K // fold
    B = x.shape[0]
    assert x.shape[1] == d_in

    # Fold `fold` consecutive samples into one K-lane row. The reshape is a free
    # contiguous re-view; a (< fold rows) pad only happens when B % fold != 0.
    b_pad = _round_up(B, fold)
    if b_pad != B:
        x = jnp.pad(x, ((0, b_pad - B), (0, 0)))
    n_rows = b_pad // fold
    xf = x.reshape(n_rows, K)

    block_rows8 = max(8, block_rows // fold)
    tb8 = _choose_batch_tile(n_rows, block_rows8)
    nt = pl.cdiv(n_rows, tb8)         # ragged last tile OK: rows are independent

    out = pl.pallas_call(
        _net_baseline_kernel,
        grid=(P, nt),
        in_specs=[
            # x streamed over the batch axis; shared across population members.
            pl.BlockSpec((tb8, K), lambda p, i: (i, 0)),
            # Weights/biases resident in VMEM across a member's batch tiles
            # (index_map constant over the inner grid axis => no re-DMA per step).
            pl.BlockSpec((pl.Squeezed(), K, N), lambda p, i: (p, 0, 0)),
            pl.BlockSpec((pl.Squeezed(), 1, N), lambda p, i: (p, 0, 0)),
            pl.BlockSpec((pl.Squeezed(), N, fold), lambda p, i: (p, 0, 0)),
            pl.BlockSpec((pl.Squeezed(), 1, 1), lambda p, i: (p, 0, 0)),
        ],
        out_specs=pl.BlockSpec((pl.Squeezed(), tb8, fold), lambda p, i: (p, i, 0)),
        out_shape=jax.ShapeDtypeStruct((P, n_rows, fold), jnp.float32),
        compiler_params=pltpu.CompilerParams(
            dimension_semantics=("parallel", "parallel")),
    )(xf, w1s, b1s, w2s, b2s)

    out = out.reshape(P, b_pad, 1)[:, :B]     # contiguous/free reshape + tail slice
    return out[0] if single else out


def init_params(key, input_dim, hidden_dim):
    """PyTorch-nn.Linear-style U(-1/sqrt(fan_in), 1/sqrt(fan_in)) init.
    Weights stored transposed: (in_features, out_features)."""
    k1, k2, k3, k4 = jax.random.split(key, 4)
    bound1 = 1.0 / jnp.sqrt(jnp.float32(input_dim))
    bound2 = 1.0 / jnp.sqrt(jnp.float32(hidden_dim))
    w1 = jax.random.uniform(k1, (input_dim, hidden_dim), jnp.float32, -bound1, bound1)
    b1 = jax.random.uniform(k2, (hidden_dim,), jnp.float32, -bound1, bound1)
    w2 = jax.random.uniform(k3, (hidden_dim, 1), jnp.float32, -bound2, bound2)
    b2 = jax.random.uniform(k4, (1,), jnp.float32, -bound2, bound2)
    return w1, b1, w2, b2


if __name__ == "__main__":
    input_dim = 16
    hidden_dim = 32
    batch = 203   # not a multiple of the fold (8) -> exercises pad + ragged tail

    key = jax.random.PRNGKey(0)
    kx, kp = jax.random.split(key)
    x = jax.random.normal(kx, (batch, input_dim), jnp.float32)
    w1, b1, w2, b2 = init_params(kp, input_dim, hidden_dim)

    # Pure-JAX reference of the forward semantics.
    ref = jnp.tanh(jnp.maximum(x @ w1 + b1, 0.0) @ w2 + b2)

    # ---- single net, f32 path (bit-tight check); small block_rows so the demo
    #      exercises a multi-step, ragged batch grid (production default: 8192).
    params = prepare_params(w1, b1, w2, b2, use_bf16=False)
    out = jax.block_until_ready(net_baseline_forward(x, params, block_rows=64))
    assert out.shape == (batch, 1)
    assert jnp.allclose(out, ref, atol=1e-5, rtol=1e-5)

    # ---- single net, bf16 MXU operands (f32 accumulation), full-block path.
    params_bf16 = prepare_params(w1, b1, w2, b2, use_bf16=True)
    out_bf16 = jax.block_until_ready(net_baseline_forward(x, params_bf16))
    assert jnp.allclose(out_bf16, ref, atol=5e-2, rtol=5e-2)

    # ---- small PPO population (P members, one pallas_call, grid (P, nt)).
    P = 3
    members, refs = [], []
    for m in range(P):
        km = jax.random.fold_in(kp, m)
        wm1, bm1, wm2, bm2 = init_params(km, input_dim, hidden_dim)
        members.append(prepare_params(wm1, bm1, wm2, bm2))
        refs.append(jnp.tanh(jnp.maximum(x @ wm1 + bm1, 0.0) @ wm2 + bm2))
    pop_params = stack_params(members)
    pop_out = jax.block_until_ready(net_baseline_forward(x, pop_params, block_rows=64))
    assert pop_out.shape == (P, batch, 1)
    assert jnp.allclose(pop_out, jnp.stack(refs), atol=1e-5, rtol=1e-5)

    print("KERNEL_OK")
</pallas_src>

<mosaic_0001>
module attributes {stable_mosaic.version = 11 : i64} {
  func.func @_net_baseline_kernel(%arg0: i32, %arg1: i32, %arg2: memref<8x128xf32, #tpu.memory_space<vmem>>, %arg3: memref<1x128x256xf32, #tpu.memory_space<vmem>>, %arg4: memref<1x1x256xf32, #tpu.memory_space<vmem>>, %arg5: memref<1x256x8xf32, #tpu.memory_space<vmem>>, %arg6: memref<1x1x1xf32, #tpu.memory_space<vmem>>, %arg7: memref<1x8x8xf32, #tpu.memory_space<vmem>>) attributes {dimension_semantics = [#tpu.dimension_semantics<parallel>, #tpu.dimension_semantics<parallel>], iteration_bounds = array<i64: 1, 4>, scalar_prefetch = 0 : i64, scratch_operands = 0 : i64, tpu.core_type = #tpu.core_type<tc>, window_params = [{transform_indices = @transform_0, window_bounds = array<i64: 8, 128>}, {transform_indices = @transform_1, window_bounds = array<i64: 1, 128, 256>}, {transform_indices = @transform_2, window_bounds = array<i64: 1, 1, 256>}, {transform_indices = @transform_3, window_bounds = array<i64: 1, 256, 8>}, {transform_indices = @transform_4, window_bounds = array<i64: 1, 1, 1>}, {transform_indices = @transform_5, window_bounds = array<i64: 1, 8, 8>}]} {
    %c0 = arith.constant 0 : index
    %c0_0 = arith.constant 0 : index
    %0 = vector.load %arg2[%c0, %c0_0] : memref<8x128xf32, #tpu.memory_space<vmem>>, vector<8x128xf32>
    %c0_1 = arith.constant 0 : index
    %c0_2 = arith.constant 0 : index
    %c0_3 = arith.constant 0 : index
    %1 = vector.load %arg3[%c0_1, %c0_2, %c0_3] : memref<1x128x256xf32, #tpu.memory_space<vmem>>, vector<1x128x256xf32>
    %2 = vector.shape_cast %1 : vector<1x128x256xf32> to vector<128x256xf32>
    %cst = arith.constant dense<0.000000e+00> : vector<8x256xf32>
    %3 = tpu.matmul %0, %2, %cst {dimension_numbers = #tpu.dot_dimension_numbers<[1], [0], [0], [1], [0, 0, 1, 1], [], []>} : vector<8x128xf32>, vector<128x256xf32>, vector<8x256xf32> -> vector<8x256xf32>
    %c0_4 = arith.constant 0 : index
    %c0_5 = arith.constant 0 : index
    %c0_6 = arith.constant 0 : index
    %4 = vector.load %arg4[%c0_4, %c0_5, %c0_6] : memref<1x1x256xf32, #tpu.memory_space<vmem>>, vector<1x1x256xf32>
    %5 = vector.shape_cast %4 : vector<1x1x256xf32> to vector<1x256xf32>
    %6 = vector.broadcast %5 : vector<1x256xf32> to vector<8x256xf32>
    %7 = arith.addf %3, %6 : vector<8x256xf32>
    %cst_7 = arith.constant 0.000000e+00 : f32
    %8 = vector.broadcast %cst_7 : f32 to vector<8x256xf32>
    %9 = arith.maximumf %7, %8 : vector<8x256xf32>
    %c0_8 = arith.constant 0 : index
    %c0_9 = arith.constant 0 : index
    %c0_10 = arith.constant 0 : index
    %10 = vector.load %arg5[%c0_8, %c0_9, %c0_10] : memref<1x256x8xf32, #tpu.memory_space<vmem>>, vector<1x256x8xf32>
    %11 = vector.shape_cast %10 : vector<1x256x8xf32> to vector<256x8xf32>
    %cst_11 = arith.constant dense<0.000000e+00> : vector<8x8xf32>
    %12 = tpu.matmul %9, %11, %cst_11 {dimension_numbers = #tpu.dot_dimension_numbers<[1], [0], [0], [1], [0, 0, 1, 1], [], []>} : vector<8x256xf32>, vector<256x8xf32>, vector<8x8xf32> -> vector<8x8xf32>
    %c0_12 = arith.constant 0 : index
    %c0_13 = arith.constant 0 : index
    %c0_14 = arith.constant 0 : index
    %13 = vector.load %arg6[%c0_12, %c0_13, %c0_14] : memref<1x1x1xf32, #tpu.memory_space<vmem>>, vector<1x1x1xf32>
    %14 = vector.shape_cast %13 : vector<1x1x1xf32> to vector<1x1xf32>
    %15 = vector.broadcast %14 : vector<1x1xf32> to vector<8x8xf32>
    %16 = arith.addf %12, %15 : vector<8x8xf32>
    %17 = math.tanh %16 : vector<8x8xf32>
    %c0_15 = arith.constant 0 : index
    %c0_16 = arith.constant 0 : index
    %c0_17 = arith.constant 0 : index
    %18 = vector.load %arg7[%c0_15, %c0_16, %c0_17] : memref<1x8x8xf32, #tpu.memory_space<vmem>>, vector<1x8x8xf32>
    %19 = vector.shape_cast %18 : vector<1x8x8xf32> to vector<8x8xf32>
    %20 = vector.shape_cast %17 : vector<8x8xf32> to vector<1x8x8xf32>
    tpu.vector_store %arg7[%c0_15, %c0_16, %c0_17], %20 {strides = array<i32>} : memref<1x8x8xf32, #tpu.memory_space<vmem>>, vector<1x8x8xf32>,
    return
  }
  func.func @transform_0(%arg0: i32, %arg1: i32) -> (i32, i32) {
    %c0_i32 = arith.constant 0 : i32
    %c0_i32_0 = arith.constant 0 : i32
    return %arg1, %c0_i32 : i32, i32
  }
  func.func @transform_1(%arg0: i32, %arg1: i32) -> (i32, i32, i32) {
    %c0_i32 = arith.constant 0 : i32
    %c0_i32_0 = arith.constant 0 : i32
    %c0_i32_1 = arith.constant 0 : i32
    return %arg0, %c0_i32, %c0_i32_0 : i32, i32, i32
  }
  func.func @transform_2(%arg0: i32, %arg1: i32) -> (i32, i32, i32) {
    %c0_i32 = arith.constant 0 : i32
    %c0_i32_0 = arith.constant 0 : i32
    %c0_i32_1 = arith.constant 0 : i32
    return %arg0, %c0_i32, %c0_i32_0 : i32, i32, i32
  }
  func.func @transform_3(%arg0: i32, %arg1: i32) -> (i32, i32, i32) {
    %c0_i32 = arith.constant 0 : i32
    %c0_i32_0 = arith.constant 0 : i32
    %c0_i32_1 = arith.constant 0 : i32
    return %arg0, %c0_i32, %c0_i32_0 : i32, i32, i32
  }
  func.func @transform_4(%arg0: i32, %arg1: i32) -> (i32, i32, i32) {
    %c0_i32 = arith.constant 0 : i32
    %c0_i32_0 = arith.constant 0 : i32
    %c0_i32_1 = arith.constant 0 : i32
    return %arg0, %c0_i32, %c0_i32_0 : i32, i32, i32
  }
  func.func @transform_5(%arg0: i32, %arg1: i32) -> (i32, i32, i32) {
    %c0_i32 = arith.constant 0 : i32
    %c0_i32_0 = arith.constant 0 : i32
    return %arg0, %arg1, %c0_i32 : i32, i32, i32
  }
}

</mosaic_0001>

<bundles_post_ra>
// kernel: tpu_custom_call.1
= control target key start
LH: loop header
LB: loop body
LE: loop exit
PB: predicated region body
PF: predicated region fallthrough
CT: control target
= control target key end

     0   :  { %s1241_s0 = inlined_call_operand.hbm [shape: f32[26,128], index: 0, kind: input, shape index: {}]   ;;  %s1242_s1 = inlined_call_operand.vmem [shape: f32[1,128,256], index: 1, kind: input, shape index: {}]   ;;  %s1243_s2 = inlined_call_operand.vmem [shape: f32[1,1,256], index: 2, kind: input, shape index: {}]   ;;  %s1244_s3 = inlined_call_operand.vmem [shape: f32[1,256,8], index: 3, kind: input, shape index: {}]   ;;  %s1245_s4 = inlined_call_operand.<no memory space> [shape: f32[1,1,1], index: 4, kind: input, shape index: {}]   ;;  %s1246_s5 = inlined_call_operand.vmem [shape: f32[1,26,8], index: 5, kind: output, shape index: {}]  }
   0x1   :  { %v10_v0 = vstv %s1245_s4 }
   0x2   :  { %11 = vst [vmem:[#allocation2] sm:$0x1] %v10_v0 }
   0x3   :  { %12 = vsyncpa [#allocation4], 0 }
   0x4   :  { %14 = vsyncpa [#allocation4 + $0x1], 0  ;;  %s941_s20 = smov 0   ;;  %s943_s21 = smov 0  }
   0x5   :  { %s945_s22 = smov 0   ;;  %s947_s23 = smov 0  }
   0x6   :  { %s949_s24 = smov 0   ;;  %s951_s25 = smov 0  }
   0x7 LB: > { %s714_s4 = sadd.s32 4294967295, %s903_s25   ;;  %s29_s26 = sadd.s32 1, %s899_s24  ;;  %s903_s25 = sphi %s951_s25, %s20_s25   ;;  %s899_s24 = sphi %s949_s24, %s1254_s24   ;;  %s895_s23 = sphi %s947_s23, %s1253_s23   ;;  %s891_s22 = sphi %s945_s22, %s1252_s22   ;;  %s887_s21 = sphi %s943_s21, %s1251_s21   ;;  %s883_s20 = sphi %s941_s20, %s1250_s20  }
   0x8   : > { %p30_p0 = scmp.ge.s32.totalorder %s29_s26, 4  ;;  %s39_s27 = sadd.s32 1, %s891_s22 }
   0x9   : > { %p46_p1 = scmp.ne.s32.totalorder %s891_s22, %s887_s21  ;;  %p47_p2 = scmp.eq.s32.totalorder %s903_s25, 0 }
   0xa   : > { %s1256_s26 = smov (%p30_p0, %s29_s26), 0  ;;  %p52_p4 = scmp.ne.s32.totalorder %s887_s21, %s883_s20 }
   0xb   : > { %p977_p3 = por %p47_p2, %p46_p1  ;;  %s36_s29 = ssub.s32 %s899_s24, %s1256_s26 }
   0xc   : > { %p53_p5 = scmp.eq.s32.totalorder %s714_s4, 0  ;;  %p37_p6 = scmp.eq.s32.totalorder %s36_s29, 0 }
   0xd   : > { %p771_p8 = scmp.lt.s32.totalorder %s903_s25, 4  ;;  %s237_s7 = sand.u32 1, %s891_s22  }
   0xe   : > { %p984_p7 = por %p53_p5, %p52_p4  ;;  %s723_s8 = sshll.u32 %s899_s24, 7 }
   0xf   : > { %s990_s6 = scalar_select %p37_p6, %s891_s22, %s39_s27  }
  0x10   : > { %s722_s9 = sshll.u32 %s237_s7, 3  ;;  %s246_s12 = scalar_lea.hbm %s1241_s0, %s723_s8 }
  0x11   : > { %s241_s13 = scalar_lea.vmem [#allocation3], %s722_s9  ;;  %p999_p9 = pnand %p771_p8, %p977_p3 }
  0x12   : > { %s248_s14 = sshll.u32 %s241_s13, 4  ;;  %p724_p10 = scmp.ge.s32.totalorder %s903_s25, 1  ;;  %s249_s14 = int_to_ptr.vmem [resolvable:$true] %s248_s14 }
  0x13   : > { %p253_p11 = scmp.lt.s32.totalorder %s903_s25, 5  ;;  %s238_s16 = scalar_lea.sflag [#allocation4], %s237_s7 }
  0x14   : > { %p827_p12 = pneg %p999_p9  ;;  %s838_s17 = scalar_lea.vmem %s249_s14, 128 }
  0x15   : > { %p839_p13 = scmp.ne.s32.totalorder %s249_s14, %s838_s17  ;;  %s905_s18 = smov [#allocation3]  }
  0x16   : > { %s843_s19 = sshll.u32 %s905_s18, 4  ;;  %s844_s19 = int_to_ptr.vmem [resolvable:$false] %s843_s19 }
  0x17   : > { %p841_p0 = pnand %p839_p13, %p827_p12  ;;  %s845_s20 = scalar_lea.vmem %s844_s19, 256 }
  0x18   : > { %p846_p2 = scmp.lt.s32.totalorder %s249_s14, %s844_s19  ;;  %p847_p3 = scmp.lt.s32.totalorder %s845_s20, %s838_s17 }
  0x19   : > { %p842_p1 = pneg %p841_p0 }
  0x1a   : > { %p848_p4 = por %p847_p3, %p846_p2 }
  0x1c   : > { %p849_p5 = pnand %p848_p4, %p842_p1 }
  0x1e   : > { %852 = shalt.err (!%p849_p5)
}
  0x1f   : > { %770 = dma.hbm_to_vmem [thread:$0]  (!%p999_p9), %s246_s12, 128, %s249_s14, %s238_s16  }
  0x20   : > { %p254_p6 = pnand %p724_p10, %p253_p11 }
  0x21   : > { %s259_s4 = sand.u32 (!%p254_p6), 1, %s887_s21  }
  0x22   : > { %257 = sbr.rel (%p254_p6) target bundleno = 487 (0x1e7), region = 40  ;;  %s1014_s27 = sshll.u32 (!%p254_p6), %s259_s4, 3 }
  0x23   : > { %s260_s28 = scalar_lea.sflag (!%p254_p6), [#allocation4], %s259_s4  ;;  %s263_s29 = scalar_lea.vmem (!%p254_p6), [#allocation3], %s1014_s27 }
  0x27   : > { %878 = dma.done.wait (%p984_p7), %s260_s28, 128  }
  0x28   : > { %880 = vsyncadd (%p984_p7), %s260_s28, 4294967168  ;;  %v906_v1 = vmov 0.0   ;;  %v367_v2 = vld [vmem:[%s1242_s1 + $0xf8] sm:$0xff]  ;;  %v366_v3 = vld [vmem:[%s1242_s1 + $0xf0] sm:$0xff]  ;;  %p329_p7 = scmp.lt.s32.totalorder %s895_s23, 3  ;;  %vm566_vm0 = vcmask 64512  }
  0x29   : > { %444 = vmatprep.mubr.f32.mxu0 %v906_v1  ;;  %v365_v4 = vld [vmem:[%s1242_s1 + $0xe8] sm:$0xff]  ;;  %380 = vmatprep.subr.mxu0 %v367_v2  ;;  %v364_v5 = vld [vmem:[%s1242_s1 + $0xe0] sm:$0xff]  ;;  %v363_v6 = vld [vmem:[%s1242_s1 + $0xd8] sm:$0xff] }
  0x2a   : > { %381 = vmatpush1.msra.mxu0 %v366_v3  ;;  %v362_v7 = vld [vmem:[%s1242_s1 + $0xd0] sm:$0xff]  ;;  %v361_v8 = vld [vmem:[%s1242_s1 + $0xc8] sm:$0xff]  ;;  %v360_v9 = vld [vmem:[%s1242_s1 + $0xc0] sm:$0xff]  ;;  %s1258_s23 = smov (!%p329_p7, %s895_s23), 3 }
  0x2b   : > { %382 = vmatprep.subr.mxu0 %v365_v4  ;;  %v359_v10 = vld [vmem:[%s1242_s1 + $0xb8] sm:$0xff]  ;;  %v358_v11 = vld [vmem:[%s1242_s1 + $0xb0] sm:$0xff]  ;;  %v357_v12 = vld [vmem:[%s1242_s1 + $0xa8] sm:$0xff]  ;;  %v907_v4 = vmov 0   ;;  %s726_s15 = sshll.u32 %s1258_s23, 3 }
  0x2c   : > { %383 = vmatpush1.msra.mxu0 %v364_v5  ;;  %v356_v13 = vld [vmem:[%s1242_s1 + $0xa0] sm:$0xff]  ;;  %v355_v14 = vld [vmem:[%s1242_s1 + $0x98] sm:$0xff]  ;;  %v354_v15 = vld [vmem:[%s1242_s1 + $0x90] sm:$0xff]  ;;  %822 = vset.pattern.permute.xlu0 %v907_v4  ;;  %v370_v5 = vlaneseq  ;;  %s334_s16 = scalar_lea.vmem %s1246_s5, %s726_s15 }
  0x2d   : > { %384 = vmatprep.subr.mxu0 %v363_v6  ;;  %v484_v16 = vld [vmem:[%s1244_s3 + $0xf8] sm:$0xff]  ;;  %v483_v18 = vld [vmem:[%s1244_s3 + $0xf0] sm:$0xff]  ;;  %v353_v19 = vld [vmem:[%s1242_s1 + $0x88] sm:$0xff] }
  0x2e   : > { %385 = vmatpush1.msra.mxu0 %v362_v7  ;;  %v468_v17 = vld [vmem:[%s1244_s3 + $0x78] sm:$0xff]  ;;  %730 = vmatprep.subr.mxu1 %v484_v16  ;;  %v467_v20 = vld [vmem:[%s1244_s3 + $0x70] sm:$0xff]  ;;  %v352_v21 = vld [vmem:[%s1242_s1 + $0x80] sm:$0xff]  ;;  %v371_v6 = vshrl.u32 %v370_v5, 7 }
  0x2f   : > { %386 = vmatprep.subr.mxu0 %v361_v8  ;;  %731 = vmatpush3.msra.mxu1 %v468_v17  ;;  %v482_v22 = vld [vmem:[%s1244_s3 + $0xe8] sm:$0xff]  ;;  %v351_v23 = vld [vmem:[%s1242_s1 + $0x78] sm:$0xff]  ;;  %v350_v25 = vld [vmem:[%s1242_s1 + $0x70] sm:$0xff] }
  0x30   : > { %387 = vmatpush1.msra.mxu0 %v360_v9  ;;  %732 = vmatprep.subr.mxu1 %v483_v18  ;;  %v466_v24 = vld [vmem:[%s1244_s3 + $0x68] sm:$0xff]  ;;  %v481_v26 = vld [vmem:[%s1244_s3 + $0xe0] sm:$0xff]  ;;  %v480_v30 = vld [vmem:[%s1244_s3 + $0xd8] sm:$0xff]  ;;  %v372_v7 = vsub.s32 0, %v371_v6  ;;  %v376_v9 = vsub.s32 1, %v371_v6 }
  0x31   : > { %388 = vmatprep.subr.mxu0 %v359_v10  ;;  %733 = vmatpush3.msra.mxu1 %v467_v20  ;;  %v349_v27 = vld [vmem:[%s1242_s1 + $0x68] sm:$0xff]  ;;  %v465_v28 = vld [vmem:[%s1244_s3 + $0x60] sm:$0xff]  ;;  %v347_v31 = vld [vmem:[%s1242_s1 + $0x58] sm:$0xff] }
  0x32   : > { %389 = vmatpush1.msra.mxu0 %v358_v11  ;;  %734 = vmatprep.subr.mxu1 %v482_v22  ;;  %v348_v29 = vld [vmem:[%s1242_s1 + $0x60] sm:$0xff]  ;;  %v464_v32 = vld [vmem:[%s1244_s3 + $0x58] sm:$0xff]  ;;  %v346_v33 = vld [vmem:[%s1242_s1 + $0x50] sm:$0xff] }
  0x33   : > { %390 = vmatprep.subr.mxu0 %v357_v12  ;;  %735 = vmatpush3.msra.mxu1 %v466_v24  ;;  %v479_v34 = vld [vmem:[%s1244_s3 + $0xd0] sm:$0xff]  ;;  %v345_v35 = vld [vmem:[%s1242_s1 + $0x48] sm:$0xff]  ;;  %v344_v37 = vld [vmem:[%s1242_s1 + $0x40] sm:$0xff] }
  0x34   : > { %391 = vmatpush1.msra.mxu0 %v356_v13  ;;  %736 = vmatprep.subr.mxu1 %v481_v26  ;;  %v463_v36 = vld [vmem:[%s1244_s3 + $0x50] sm:$0xff]  ;;  %v478_v38 = vld [vmem:[%s1244_s3 + $0xc8] sm:$0xff]  ;;  %v343_v39 = vld [vmem:[%s1242_s1 + $0x38] sm:$0xff] }
  0x35   : > { %392 = vmatprep.subr.mxu0 %v355_v14  ;;  %737 = vmatpush3.msra.mxu1 %v465_v28  ;;  %v462_v40 = vld [vmem:[%s1244_s3 + $0x48] sm:$0xff]  ;;  %v342_v41 = vld [vmem:[%s1242_s1 + $0x30] sm:$0xff]  ;;  %v477_v42 = vld [vmem:[%s1244_s3 + $0xc0] sm:$0xff] }
  0x36   : > { %393 = vmatpush1.msra.mxu0 %v354_v15  ;;  %738 = vmatprep.subr.mxu1 %v480_v30  ;;  %v341_v43 = vld [vmem:[%s1242_s1 + $0x28] sm:$0xff]  ;;  %v461_v44 = vld [vmem:[%s1244_s3 + $0x40] sm:$0xff]  ;;  %v476_v46 = vld [vmem:[%s1244_s3 + $0xb8] sm:$0xff] }
  0x37   : > { %394 = vmatprep.subr.mxu0 %v353_v19  ;;  %739 = vmatpush3.msra.mxu1 %v464_v32  ;;  %v340_v45 = vld [vmem:[%s1242_s1 + $0x20] sm:$0xff]  ;;  %v339_v47 = vld [vmem:[%s1242_s1 + $0x18] sm:$0xff]  ;;  %v338_v49 = vld [vmem:[%s1242_s1 + $0x10] sm:$0xff] }
  0x38   : > { %395 = vmatpush1.msra.mxu0 %v352_v21  ;;  %740 = vmatprep.subr.mxu1 %v479_v34  ;;  %v460_v48 = vld [vmem:[%s1244_s3 + $0x38] sm:$0xff]  ;;  %v475_v50 = vld [vmem:[%s1244_s3 + $0xb0] sm:$0xff]  ;;  %v337_v51 = vld [vmem:[%s1242_s1 + $0x8] sm:$0xff] }
  0x39   : > { %396 = vmatprep.subr.mxu0 %v351_v23  ;;  %741 = vmatpush3.msra.mxu1 %v463_v36  ;;  %v459_v52 = vld [vmem:[%s1244_s3 + $0x30] sm:$0xff]  ;;  %v336_v53 = vld [vmem:[%s1242_s1] sm:$0xff]  ;;  %v474_v54 = vld [vmem:[%s1244_s3 + $0xa8] sm:$0xff] }
  0x3a   : > { %397 = vmatpush1.msra.mxu0 %v350_v25  ;;  %742 = vmatprep.subr.mxu1 %v478_v38  ;;  %v335_v55 = vld [vmem:[%s263_s29] sm:$0xff]  ;;  %v472_v59 = vld [vmem:[%s1244_s3 + $0x98] sm:$0xff]  ;;  %v727_v3 = vld [vmem:[#allocation2] ss:$0 sm:$0xff] }
  0x3b   : > { %398 = vmatprep.subr.mxu0 %v349_v27  ;;  %743 = vmatpush3.msra.mxu1 %v462_v40  ;;  %v458_v56 = vld [vmem:[%s1244_s3 + $0x28] sm:$0xff]  ;;  %v473_v57 = vld [vmem:[%s1244_s3 + $0xa0] sm:$0xff]  ;;  %v456_v60 = vld [vmem:[%s1244_s3 + $0x18] sm:$0xff] }
  0x3c   : > { %399 = vmatpush1.msra.mxu0 %v348_v29  ;;  %744 = vmatprep.subr.mxu1 %v477_v42  ;;  %v457_v58 = vld [vmem:[%s1244_s3 + $0x20] sm:$0xff]  ;;  %v471_v61 = vld [vmem:[%s1244_s3 + $0x90] sm:$0xff]  ;;  %v470_v63 = vld [vmem:[%s1244_s3 + $0x88] sm:$0xff] }
  0x3d   : > { %400 = vmatprep.subr.mxu0 %v347_v31  ;;  %745 = vmatpush3.msra.mxu1 %v461_v44  ;;  %v455_v62 = vld [vmem:[%s1244_s3 + $0x10] sm:$0xff]  ;;  %v454_v0 = vld [vmem:[%s1244_s3 + $0x8] sm:$0xff]  ;;  %v469_v1 = vld [vmem:[%s1244_s3 + $0x80] sm:$0xff] }
  0x3e   : > { %401 = vmatpush1.msra.mxu0 %v346_v33  ;;  %746 = vmatprep.subr.mxu1 %v476_v46  ;;  %v453_v2 = vld [vmem:[%s1244_s3] sm:$0xff] }
  0x3f   : > { %402 = vmatprep.subr.mxu0 %v345_v35  ;;  %747 = vmatpush3.msra.mxu1 %v460_v48  ;;  %v368_v8 = vld [vmem:[%s1243_s2] sm:$0x3] }
  0x40   : > { %403 = vmatpush1.msra.mxu0 %v344_v37  ;;  %748 = vmatprep.subr.mxu1 %v475_v50  ;;  %v373_v10 = vrot.slane %v368_v8, %v372_v7  ;;  %v377_v11 = vrot.slane %v368_v8, %v376_v9 }
  0x41   : > { %404 = vmatprep.subr.mxu0 %v343_v39  ;;  %749 = vmatpush3.msra.mxu1 %v459_v52 }
  0x42   : > { %405 = vmatpush1.msra.mxu0 %v342_v41  ;;  %750 = vmatprep.subr.mxu1 %v474_v54 }
  0x43   : > { %406 = vmatprep.subr.mxu0 %v341_v43  ;;  %751 = vmatpush3.msra.mxu1 %v458_v56 }
  0x44   : > { %407 = vmatpush1.msra.mxu0 %v340_v45  ;;  %752 = vmatprep.subr.mxu1 %v473_v57 }
  0x45   : > { %408 = vmatprep.subr.mxu0 %v339_v47  ;;  %753 = vmatpush3.msra.mxu1 %v457_v58 }
  0x46   : > { %409 = vmatpush1.msra.mxu0 %v338_v49  ;;  %754 = vmatprep.subr.mxu1 %v472_v59 }
  0x47   : > { %410 = vmatprep.subr.mxu0 %v337_v51  ;;  %755 = vmatpush3.msra.mxu1 %v456_v60 }
  0x48   : > { %411 = vmatpush1.msra.mxu0 %v336_v53  ;;  %756 = vmatprep.subr.mxu1 %v471_v61 }
  0x49   : > { %445 = vmatmul.mubr.f32.vlgmr.msra.gmra.mxu0 %v335_v55  ;;  %757 = vmatpush3.msra.mxu1 %v455_v62 }
  0x4a   : > { %758 = vmatprep.subr.mxu1 %v470_v63  ;;  %492 = vperm.xlu0 %822, %v727_v3  }
  0x4b   : > { %759 = vmatpush3.msra.mxu1 %v454_v0 }
  0x4c   : > { %760 = vmatprep.subr.mxu1 %v469_v1 }
  0x4d   : > { %761 = vmatpush3.msra.mxu1 %v453_v2 }
  0xc5   : > { %v493_v20 = vpop.permute.xlu0 %492 }
 0x109   : > { %v446_v12 = vpop.f32.mrf.mxu0 }
 0x10a   : > { %v447_v13 = vadd.f32 %v446_v12, %v373_v10 }
 0x10b   : > { %v448_v14 = vpop.f32.mrf.mxu0 }
 0x10c   : > { %v449_v15 = vadd.f32 %v448_v14, %v377_v11  ;;  %v451_v17 = vmax.f32 %v447_v13, 0.0 }
 0x10e   : > { %v452_v16 = vmax.f32 %v449_v15, 0.0 }
 0x110   : > { %559 = vmatprep.mubr.f32.mxu1 %v452_v16 }
 0x111   : > { %560 = vmatmul.mubr.f32.vlgmr.msra.gmra.mxu1 %v451_v17 }
 0x1d1   : > { %v762_v18 = vpop.f32.mrf.mxu1 }
 0x1d3   : > { %v763_v19 = vpop.f32.mrf.mxu1 }
 0x1d4   : > { %v764_v21 = vadd.f32 %v763_v19, %v762_v18 }
 0x1d6   : > { %v562_v22 = vadd.f32 %v764_v21, %v493_v20 }
 0x1d8   : > { %823 = vtanh.f32 %v562_v22 }
 0x1e5   : > { %v824_v23 = vpop.eup %823 }
 0x1e6   : > { %567 = vst.msk [vmem:[%s334_s16] sm:$0xff] %vm566_vm0, %v824_v23 }
 0x1e7 PF: > { %s20_s25 = sadd.s32 1, %s903_s25   ;;  %s1250_s20 = smov %s887_s21 }
 0x1e8   : > { %p17_p8 = scmp.ge.s32.totalorder %s20_s25, 6   ;;  %s1251_s21 = smov %s891_s22 }
 0x1e9   : > { %s1252_s22 = smov %s990_s6  ;;  %s1253_s23 = smov %s899_s24 }
 0x1ea   : > { %s1254_s24 = smov %s1256_s26  ;;  %19 = sbr.rel (!%p17_p8) target bundleno = 7 (0x7), region = 92 }
 0x1ef   :  { %595 = vsyncpa [#allocation4], 1 }
 0x1f0   :  { %597 = vsyncpa [#allocation4 + $0x1], 1 }

</bundles_post_ra>
